<compile_context>
chip_gen: v7x
topology: tpu7x:2x2x1
jax: 0.10.0
libtpu: 0.0.40
codegen_flags: <defaults>
</compile_context>

<pallas_src>
import functools
import math
from typing import NamedTuple

import jax
import jax.numpy as jnp
from jax import lax
from jax.experimental import pallas as pl
from jax.experimental.pallas import tpu as pltpu

_INV_SQRT2 = 1.0 / math.sqrt(2.0)


def _round_up(x, m):
    return ((x + m - 1) // m) * m


def _sublane(dtype):
    # rows per sublane-packed tile: f32 -> 8, bf16 -> 16, int8/fp8 -> 32
    return {1: 32, 2: 16}.get(jnp.dtype(dtype).itemsize, 8)


def _vmem_capacity_bytes():
    try:
        cap = int(pltpu.get_tpu_info().vmem_capacity_bytes)
        if cap > 0:
            return cap
    except Exception:
        pass
    return 64 * 1024 * 1024  # conservative fallback (v7x-sized per-TC VMEM)


def _gelu_f32(h, approximate):
    if approximate:
        # tanh approximation -> EUP slot (free alongside the MXU). Numerics
        # differ slightly from nn.GELU()'s default, hence opt-in only.
        return jax.nn.gelu(h, approximate=True)
    # Exact erf form, matching PyTorch's nn.GELU() default.
    return 0.5 * h * (1.0 + lax.erf(h * jnp.float32(_INV_SQRT2)))


# ----------------------------- kernels --------------------------------------


def _mlp_kernel_resident(x_ref, w1_ref, b1_ref, w2_ref, b2_ref, o_ref, *,
                         approximate):
    # Weights are VMEM-resident across the whole grid (constant index_maps);
    # each step handles one row tile end-to-end.
    h = jnp.dot(x_ref[...], w1_ref[...], preferred_element_type=jnp.float32)
    h = h + b1_ref[...].astype(jnp.float32)
    h = _gelu_f32(h, approximate)
    # TODO(synk): dropout_rate=0.0 -> identity; a nonzero rate would build a
    # keep mask here with pltpu.prng_seed / pltpu.prng_random_bits.
    out = jnp.dot(h.astype(x_ref.dtype), w2_ref[...],
                  preferred_element_type=jnp.float32)
    o_ref[...] = (out + b2_ref[...].astype(jnp.float32)).astype(o_ref.dtype)


def _mlp_kernel_streamed(x_ref, w1_ref, b1_ref, w2_ref, b2_ref, o_ref, acc_ref,
                         *, approximate):
    h_idx = pl.program_id(1)

    @pl.when(h_idx == 0)
    def _init():
        acc_ref[...] = jnp.zeros_like(acc_ref)

    # fc1 partial slab: (tile_m, tile_h), accumulate on the MXU in f32.
    h = jnp.dot(x_ref[...], w1_ref[...], preferred_element_type=jnp.float32)
    h = h + b1_ref[...].astype(jnp.float32)
    h = _gelu_f32(h, approximate)
    # TODO(synk): dropout_rate=0.0 -> identity (see note above).

    # fc2 partial: feed the MXU in the input dtype (bf16-native path when the
    # inputs are bf16), accumulate in the f32 scratch across hidden chunks.
    acc_ref[...] += jnp.dot(h.astype(x_ref.dtype), w2_ref[...],
                            preferred_element_type=jnp.float32)

    @pl.when(h_idx == pl.num_programs(1) - 1)
    def _finalize():
        o_ref[...] = (acc_ref[...] + b2_ref[...].astype(jnp.float32)).astype(
            o_ref.dtype)


# ----------------------- VMEM cost models & config --------------------------


def _vmem_resident(tm, emb_p, mlp_p, out_p, itemsize):
    # double-buffered blocks + in-kernel f32 hidden activation (+ downcast copy)
    blocks = 2 * itemsize * (tm * emb_p + emb_p * mlp_p + mlp_p
                             + mlp_p * out_p + out_p + tm * out_p)
    inter = tm * mlp_p * (4 + itemsize)
    return blocks + inter


def _vmem_streamed(tm, th, emb_p, out_p, itemsize):
    blocks = 2 * itemsize * (tm * emb_p + emb_p * th + th
                             + th * out_p + out_p + tm * out_p)
    acc = 4 * tm * out_p
    inter = tm * th * (4 + itemsize)
    return blocks + acc + inter


class MlpParams(NamedTuple):
    w1: jax.Array        # [emb_p, mlp_p]   (padded, transposed vs. torch)
    b1: jax.Array        # [1, mlp_p]
    w2: jax.Array        # [mlp_p, out_p]
    b2: jax.Array        # [1, out_p]
    emb_dim: int
    mlp_dim: int
    output_dim: int
    mode: str            # 'resident' | 'streamed'
    tile_m: int          # max row tile (clamped to N at call time)
    tile_h: int          # hidden tile (== padded mlp_dim in 'resident' mode)
    vmem_limit: int


def prepare_mlp_params(w1, b1, w2, b2, *, example_rows=None, tile_h=None,
                       max_tile_m=None, vmem_limit_bytes=None):
    """Pad & lay out the weights once (call at init, not per forward).

    w1: [emb_dim, mlp_dim], w2: [mlp_dim, output_dim] (transposed vs. torch so
    the kernel does plain row-major MXU matmuls). Passing tile_h forces the
    hidden-streaming path (used for testing / huge MLPs).
    """
    emb_dim, mlp_dim = w1.shape
    mlp_dim2, output_dim = w2.shape
    assert mlp_dim2 == mlp_dim
    itemsize = jnp.dtype(w1.dtype).itemsize
    sub = _sublane(w1.dtype)

    cap = _vmem_capacity_bytes()
    if vmem_limit_bytes is None:
        # ~100 MiB on 128 MiB chips (v5e/v6e), ~48 MiB on 64 MiB chips (v7x).
        vmem_limit_bytes = min(cap - (16 << 20), int(cap * 0.8))
    budget = int(vmem_limit_bytes * 0.85)  # headroom for compiler scratch

    emb_p = _round_up(emb_dim, 128)
    out_p = _round_up(output_dim, 128)
    mlp_p128 = _round_up(mlp_dim, 128)

    if max_tile_m is None:
        # v7x (64 MiB VMEM/TC, ~310 flop/B roofline) is compute-bound by
        # tile_m ~ 512; v5e/v6e (128 MiB) benefit from up to 1024 when streaming.
        max_tile_m = 512 if cap <= (64 << 20) else 1024
    if example_rows is None:
        n_cap = _round_up(max_tile_m, sub)
    else:
        n_cap = _round_up(max(int(example_rows), sub), sub)

    base = (1024, 768, 512, 384, 256, 192, 128, 64, 32, 16, 8)
    cands = sorted({_round_up(min(t, max_tile_m, n_cap), sub) for t in base},
                   reverse=True)

    mode = None
    sel_tm = sel_th = None

    if tile_h is None:
        # Preferred: weight-resident layout. Weights are DMA'd once and stay
        # in VMEM across every row tile (constant index_maps -> no re-fetch).
        min_res_tm = min(256, n_cap)
        for tm in cands:
            if tm >= min_res_tm and _vmem_resident(
                    tm, emb_p, mlp_p128, out_p, itemsize) <= budget:
                mode, sel_tm, sel_th = "resident", tm, mlp_p128
                break

    if mode is None:
        th_cands = (tile_h,) if tile_h is not None else (512, 256, 128)
        for tm in cands:                     # tile_m is the intensity lever
            for th in th_cands:
                th_r = _round_up(th, 128)
                if _vmem_streamed(tm, th_r, emb_p, out_p, itemsize) <= budget:
                    mode, sel_tm, sel_th = "streamed", tm, th_r
                    break
            if mode is not None:
                break

    if mode is None:  # pathological fallback: smallest legal config
        mode = "streamed"
        sel_tm = sub
        sel_th = _round_up(tile_h, 128) if tile_h is not None else 128

    mlp_p = _round_up(mlp_dim, sel_th)

    def pad2(a, r, c):
        pr, pc = r - a.shape[0], c - a.shape[1]
        if pr == 0 and pc == 0:
            return a
        return jnp.pad(a, ((0, pr), (0, pc)))

    w1_p = pad2(w1, emb_p, mlp_p)
    b1_p = pad2(b1.reshape(1, -1), 1, mlp_p)
    w2_p = pad2(w2, mlp_p, out_p)
    b2_p = pad2(b2.reshape(1, -1), 1, out_p)

    return MlpParams(w1_p, b1_p, w2_p, b2_p, emb_dim, mlp_dim, output_dim,
                     mode, sel_tm, sel_th, int(vmem_limit_bytes))


# ------------------------------ forward -------------------------------------


def mlp_apply(x, params: MlpParams, *, tile_m=None, approximate=False):
    """x: [..., emb_dim] -> [..., output_dim]."""
    assert x.shape[-1] == params.emb_dim
    emb_dim, mlp_dim, output_dim = params.emb_dim, params.mlp_dim, params.output_dim
    emb_p, mlp_p = params.w1.shape
    out_p = params.w2.shape[1]

    lead = x.shape[:-1]
    n = int(math.prod(lead)) if lead else 1
    x2 = x.reshape(n, emb_dim)

    sub = _sublane(x.dtype)
    tm = params.tile_m if tile_m is None else tile_m
    tm = _round_up(min(tm, _round_up(n, sub)), sub)
    n_p = _round_up(n, tm)

    if n_p != n or emb_p != emb_dim:
        x2 = jnp.pad(x2, ((0, n_p - n), (0, emb_p - emb_dim)))

    grid_m = n_p // tm
    x_item = jnp.dtype(x.dtype).itemsize
    w_item = jnp.dtype(params.w1.dtype).itemsize
    flops = 2 * n * emb_dim * mlp_dim + 2 * n * mlp_dim * output_dim
    trans = n * mlp_dim
    io_bytes = n_p * emb_p * x_item + n_p * out_p * x_item
    w_once = (emb_p * mlp_p + mlp_p + mlp_p * out_p) * w_item + out_p * w_item

    cp_kwargs = dict(vmem_limit_bytes=params.vmem_limit)

    if params.mode == "resident":
        # TODO(synk): on v7x (2 TensorCores) with grid_m == 1, split rows (or
        # the output dim) two ways so the second core isn't idle.
        cost = pl.CostEstimate(flops=flops, transcendentals=trans,
                               bytes_accessed=io_bytes + w_once)
        kernel = functools.partial(_mlp_kernel_resident, approximate=approximate)
        out = pl.pallas_call(
            kernel,
            out_shape=jax.ShapeDtypeStruct((n_p, out_p), x.dtype),
            grid_spec=pltpu.PrefetchScalarGridSpec(
                num_scalar_prefetch=0,
                grid=(grid_m,),
                in_specs=[
                    pl.BlockSpec((tm, emb_p), lambda i: (i, 0)),
                    pl.BlockSpec((emb_p, mlp_p), lambda i: (0, 0)),  # resident
                    pl.BlockSpec((1, mlp_p), lambda i: (0, 0)),
                    pl.BlockSpec((mlp_p, out_p), lambda i: (0, 0)),  # resident
                    pl.BlockSpec((1, out_p), lambda i: (0, 0)),
                ],
                out_specs=pl.BlockSpec((tm, out_p), lambda i: (i, 0)),
            ),
            compiler_params=pltpu.CompilerParams(
                dimension_semantics=("parallel",), **cp_kwargs),
            cost_estimate=cost,
        )(x2, params.w1, params.b1, params.w2, params.b2)
    else:
        th = params.tile_h
        grid_h = mlp_p // th
        # Weights are re-streamed once per row tile (index wraps h -> 0).
        cost = pl.CostEstimate(
            flops=flops, transcendentals=trans,
            bytes_accessed=io_bytes + out_p * w_item
            + grid_m * (emb_p * mlp_p + mlp_p + mlp_p * out_p) * w_item)
        kernel = functools.partial(_mlp_kernel_streamed, approximate=approximate)
        out = pl.pallas_call(
            kernel,
            out_shape=jax.ShapeDtypeStruct((n_p, out_p), x.dtype),
            grid_spec=pltpu.PrefetchScalarGridSpec(
                num_scalar_prefetch=0,
                grid=(grid_m, grid_h),
                in_specs=[
                    # x row-tile: constant across the hidden axis (resident).
                    pl.BlockSpec((tm, emb_p), lambda i, h: (i, 0)),
                    pl.BlockSpec((emb_p, th), lambda i, h: (0, h)),
                    pl.BlockSpec((1, th), lambda i, h: (0, h)),
                    pl.BlockSpec((th, out_p), lambda i, h: (h, 0)),
                    pl.BlockSpec((1, out_p), lambda i, h: (0, 0)),
                ],
                out_specs=pl.BlockSpec((tm, out_p), lambda i, h: (i, 0)),
                scratch_shapes=[pltpu.VMEM((tm, out_p), jnp.float32)],
            ),
            compiler_params=pltpu.CompilerParams(
                dimension_semantics=("parallel", "arbitrary"), **cp_kwargs),
            cost_estimate=cost,
        )(x2, params.w1, params.b1, params.w2, params.b2)

    if n_p != n or out_p != output_dim:
        out = out[:n, :output_dim]
    return out.reshape(*lead, output_dim)


def mlp_pallas(x, w1, b1, w2, b2, *, tile_m=None, tile_h=None,
               approximate=False):
    """Convenience wrapper: prepare (pad) + apply in one call."""
    lead = x.shape[:-1]
    n = int(math.prod(lead)) if lead else 1
    params = prepare_mlp_params(w1, b1, w2, b2, example_rows=n, tile_h=tile_h)
    return mlp_apply(x, params, tile_m=tile_m, approximate=approximate)


# --------------------------- init & reference -------------------------------


def init_mlp_params(key, emb_dim, mlp_dim, output_dim, dtype=jnp.float32):
    """Deterministic synthetic init mimicking nn.Linear's uniform fan-in init."""
    k1, k2, k3, k4 = jax.random.split(key, 4)
    bound1 = 1.0 / math.sqrt(emb_dim)
    bound2 = 1.0 / math.sqrt(mlp_dim)
    w1 = jax.random.uniform(k1, (emb_dim, mlp_dim), dtype, -bound1, bound1)
    b1 = jax.random.uniform(k2, (mlp_dim,), dtype, -bound1, bound1)
    w2 = jax.random.uniform(k3, (mlp_dim, output_dim), dtype, -bound2, bound2)
    b2 = jax.random.uniform(k4, (output_dim,), dtype, -bound2, bound2)
    return w1, b1, w2, b2


def mlp_reference(x, w1, b1, w2, b2):
    h = x @ w1 + b1
    h = 0.5 * h * (1.0 + lax.erf(h / jnp.sqrt(2.0)))
    return h @ w2 + b2


if __name__ == "__main__":
    key = jax.random.PRNGKey(0)

    # --- test 1: small f32 shapes (toy config) -> weight-resident path ---
    kx, kp = jax.random.split(key)
    batch, seq = 2, 8
    emb_dim, mlp_dim, output_dim = 32, 64, 32
    x = jax.random.normal(kx, (batch, seq, emb_dim), dtype=jnp.float32)
    w1, b1, w2, b2 = init_mlp_params(kp, emb_dim, mlp_dim, output_dim)

    params1 = prepare_mlp_params(w1, b1, w2, b2, example_rows=batch * seq)
    out = jax.block_until_ready(mlp_apply(x, params1))
    ref = mlp_reference(x, w1, b1, w2, b2)
    assert out.shape == (batch, seq, output_dim)
    assert jnp.allclose(out, ref, atol=1e-5, rtol=1e-5)

    # --- test 2: non-128-aligned dims + multi-tile grid, forced streaming
    #     path (grid_m=3, grid_h=2 exercises the accumulator) ---
    kx2, kp2 = jax.random.split(jax.random.PRNGKey(1))
    batch2, seq2 = 2, 20
    emb2, mlp2, out2 = 48, 192, 96
    x2 = jax.random.normal(kx2, (batch2, seq2, emb2), dtype=jnp.float32)
    p2 = init_mlp_params(kp2, emb2, mlp2, out2)

    y2 = mlp_pallas(x2, *p2, tile_m=16, tile_h=128)
    y2 = jax.block_until_ready(y2)
    ref2 = mlp_reference(x2, *p2)
    assert y2.shape == (batch2, seq2, out2)
    assert jnp.allclose(y2, ref2, atol=1e-5, rtol=1e-5)

    # --- test 3: bf16 inputs/weights (native MXU path, f32 accumulation) ---
    kx3, kp3 = jax.random.split(jax.random.PRNGKey(2))
    emb3, mlp3, out3 = 64, 256, 64
    x3 = jax.random.normal(kx3, (2, 24, emb3), dtype=jnp.float32).astype(jnp.bfloat16)
    w1b, b1b, w2b, b2b = [p.astype(jnp.bfloat16)
                          for p in init_mlp_params(kp3, emb3, mlp3, out3)]
    params3 = prepare_mlp_params(w1b, b1b, w2b, b2b, example_rows=2 * 24)
    y3 = jax.block_until_ready(mlp_apply(x3, params3))
    ref3 = mlp_reference(x3.astype(jnp.float32), w1b.astype(jnp.float32),
                         b1b.astype(jnp.float32), w2b.astype(jnp.float32),
                         b2b.astype(jnp.float32))
    assert y3.shape == (2, 24, out3)
    assert jnp.allclose(y3.astype(jnp.float32), ref3, atol=6e-2, rtol=6e-2)

    print("KERNEL_OK")
</pallas_src>

<mosaic_0001>
module attributes {stable_mosaic.version = 11 : i64} {
  func.func @_mlp_kernel_resident(%arg0: i32, %arg1: memref<16x128xf32, #tpu.memory_space<vmem>>, %arg2: memref<128x128xf32, #tpu.memory_space<vmem>>, %arg3: memref<1x128xf32, #tpu.memory_space<vmem>>, %arg4: memref<128x128xf32, #tpu.memory_space<vmem>>, %arg5: memref<1x128xf32, #tpu.memory_space<vmem>>, %arg6: memref<16x128xf32, #tpu.memory_space<vmem>>) attributes {dimension_semantics = [#tpu.dimension_semantics<parallel>], iteration_bounds = array<i64: 1>, scalar_prefetch = 0 : i64, scratch_operands = 0 : i64, tpu.core_type = #tpu.core_type<tc>, window_params = [{transform_indices = @transform_0, window_bounds = array<i64: 16, 128>}, {pipeline_mode = #tpu.pipeline_mode<synchronous>, transform_indices = @transform_1, window_bounds = array<i64: 128, 128>}, {pipeline_mode = #tpu.pipeline_mode<synchronous>, transform_indices = @transform_2, window_bounds = array<i64: 1, 128>}, {pipeline_mode = #tpu.pipeline_mode<synchronous>, transform_indices = @transform_3, window_bounds = array<i64: 128, 128>}, {pipeline_mode = #tpu.pipeline_mode<synchronous>, transform_indices = @transform_4, window_bounds = array<i64: 1, 128>}, {transform_indices = @transform_5, window_bounds = array<i64: 16, 128>}]} {
    %c0 = arith.constant 0 : index
    %c0_0 = arith.constant 0 : index
    %0 = vector.load %arg1[%c0, %c0_0] : memref<16x128xf32, #tpu.memory_space<vmem>>, vector<16x128xf32>
    %c0_1 = arith.constant 0 : index
    %c0_2 = arith.constant 0 : index
    %1 = vector.load %arg2[%c0_1, %c0_2] : memref<128x128xf32, #tpu.memory_space<vmem>>, vector<128x128xf32>
    %cst = arith.constant dense<0.000000e+00> : vector<16x128xf32>
    %2 = tpu.matmul %0, %1, %cst {dimension_numbers = #tpu.dot_dimension_numbers<[1], [0], [0], [1], [0, 0, 1, 1], [], []>} : vector<16x128xf32>, vector<128x128xf32>, vector<16x128xf32> -> vector<16x128xf32>
    %c0_3 = arith.constant 0 : index
    %c0_4 = arith.constant 0 : index
    %3 = vector.load %arg3[%c0_3, %c0_4] : memref<1x128xf32, #tpu.memory_space<vmem>>, vector<1x128xf32>
    %4 = vector.broadcast %3 : vector<1x128xf32> to vector<16x128xf32>
    %5 = arith.addf %2, %4 : vector<16x128xf32>
    %cst_5 = arith.constant 5.000000e-01 : f32
    %6 = vector.broadcast %cst_5 : f32 to vector<16x128xf32>
    %7 = arith.mulf %6, %5 : vector<16x128xf32>
    %cst_6 = arith.constant 0.707106769 : f32
    %8 = vector.broadcast %cst_6 : f32 to vector<16x128xf32>
    %9 = arith.mulf %5, %8 : vector<16x128xf32>
    %10 = math.erf %9 : vector<16x128xf32>
    %cst_7 = arith.constant 1.000000e+00 : f32
    %11 = vector.broadcast %cst_7 : f32 to vector<16x128xf32>
    %12 = arith.addf %11, %10 : vector<16x128xf32>
    %13 = arith.mulf %7, %12 : vector<16x128xf32>
    %c0_8 = arith.constant 0 : index
    %c0_9 = arith.constant 0 : index
    %14 = vector.load %arg4[%c0_8, %c0_9] : memref<128x128xf32, #tpu.memory_space<vmem>>, vector<128x128xf32>
    %cst_10 = arith.constant dense<0.000000e+00> : vector<16x128xf32>
    %15 = tpu.matmul %13, %14, %cst_10 {dimension_numbers = #tpu.dot_dimension_numbers<[1], [0], [0], [1], [0, 0, 1, 1], [], []>} : vector<16x128xf32>, vector<128x128xf32>, vector<16x128xf32> -> vector<16x128xf32>
    %c0_11 = arith.constant 0 : index
    %c0_12 = arith.constant 0 : index
    %16 = vector.load %arg5[%c0_11, %c0_12] : memref<1x128xf32, #tpu.memory_space<vmem>>, vector<1x128xf32>
    %17 = vector.broadcast %16 : vector<1x128xf32> to vector<16x128xf32>
    %18 = arith.addf %15, %17 : vector<16x128xf32>
    %c0_13 = arith.constant 0 : index
    %c0_14 = arith.constant 0 : index
    %19 = vector.load %arg6[%c0_13, %c0_14] : memref<16x128xf32, #tpu.memory_space<vmem>>, vector<16x128xf32>
    tpu.vector_store %arg6[%c0_13, %c0_14], %18 {strides = array<i32>} : memref<16x128xf32, #tpu.memory_space<vmem>>, vector<16x128xf32>,
    return
  }
  func.func @transform_0(%arg0: i32) -> (i32, i32) {
    %c0_i32 = arith.constant 0 : i32
    %c0_i32_0 = arith.constant 0 : i32
    return %arg0, %c0_i32 : i32, i32
  }
  func.func @transform_1(%arg0: i32) -> (i32, i32) {
    %c0_i32 = arith.constant 0 : i32
    %c0_i32_0 = arith.constant 0 : i32
    %c0_i32_1 = arith.constant 0 : i32
    return %c0_i32, %c0_i32_0 : i32, i32
  }
  func.func @transform_2(%arg0: i32) -> (i32, i32) {
    %c0_i32 = arith.constant 0 : i32
    %c0_i32_0 = arith.constant 0 : i32
    %c0_i32_1 = arith.constant 0 : i32
    return %c0_i32, %c0_i32_0 : i32, i32
  }
  func.func @transform_3(%arg0: i32) -> (i32, i32) {
    %c0_i32 = arith.constant 0 : i32
    %c0_i32_0 = arith.constant 0 : i32
    %c0_i32_1 = arith.constant 0 : i32
    return %c0_i32, %c0_i32_0 : i32, i32
  }
  func.func @transform_4(%arg0: i32) -> (i32, i32) {
    %c0_i32 = arith.constant 0 : i32
    %c0_i32_0 = arith.constant 0 : i32
    %c0_i32_1 = arith.constant 0 : i32
    return %c0_i32, %c0_i32_0 : i32, i32
  }
  func.func @transform_5(%arg0: i32) -> (i32, i32) {
    %c0_i32 = arith.constant 0 : i32
    %c0_i32_0 = arith.constant 0 : i32
    return %arg0, %c0_i32 : i32, i32
  }
}

</mosaic_0001>

<bundles_post_ra>
// kernel: tpu_custom_call.1
= control target key start
LH: loop header
LB: loop body
LE: loop exit
PB: predicated region body
PF: predicated region fallthrough
CT: control target
= control target key end

     0   :  { %10 = vsyncpa [#allocation3], 0  ;;  %s675_s0 = inlined_call_operand.hbm [shape: f32[16,128], index: 0, kind: input, shape index: {}]   ;;  %s676_s1 = inlined_call_operand.hbm [shape: f32[128,128], index: 1, kind: input, shape index: {}]   ;;  %s677_s2 = inlined_call_operand.vmem [shape: f32[1,128], index: 2, kind: input, shape index: {}]   ;;  %s678_s3 = inlined_call_operand.hbm [shape: f32[128,128], index: 3, kind: input, shape index: {}]   ;;  %s679_s4 = inlined_call_operand.vmem [shape: f32[1,128], index: 4, kind: input, shape index: {}]   ;;  %s680_s5 = inlined_call_operand.hbm [shape: f32[16,128], index: 5, kind: output, shape index: {}]  }
   0x1   :  { %11 = vsyncpa [#allocation6], 0 }
   0x2   :  { %12 = vsyncpa [#allocation4], 0  ;;  %s566_s18 = smov [#allocation5]   ;;  %s567_s20 = smov [#allocation2]  }
   0x3   :  { %s30_s19 = sshll.u32 %s566_s18, 4  ;;  %s18_s21 = sshll.u32 %s567_s20, 4  ;;  %s31_s19 = int_to_ptr.vmem [resolvable:$true] %s30_s19  ;;  %s602_s21 = int_to_ptr.vmem [resolvable:$true] %s18_s21 }
   0x4   :  { %s472_s24 = scalar_lea.hbm %s676_s1, 2048 }
   0x5   :  { %p473_p0 = scmp.ne.s32.totalorder %s676_s1, %s472_s24  ;;  %p476_p1 = scmp.lt.u32.totalorder %s472_s24, %s676_s1 }
   0x7   :  { %p478_p2 = pnand %p476_p1, %p473_p0 }
   0x9   :  { %481 = shalt.err (!%p478_p2)
}
   0xa   :  { %s482_s29 = scalar_lea.vmem %s31_s19, 2048  ;;  %p487_p4 = scmp.lt.s32.totalorder %s31_s19, %s31_s19 }
   0xb   :  { %p483_p3 = scmp.ne.s32.totalorder %s31_s19, %s482_s29  ;;  %p488_p5 = scmp.lt.s32.totalorder %s482_s29, %s482_s29 }
   0xd   :  { %p489_p6 = por %p488_p5, %p487_p4 }
   0xf   :  { %p490_p7 = pnand %p489_p6, %p483_p3 }
  0x11   :  { %493 = shalt.err (!%p490_p7)
}
  0x12   :  { %s568_s30 = smov 128   ;;  %s569_s6 = smov 8  }
  0x13   :  { %36 = dma.hbm_to_vmem [thread:$0]  %s676_s1, 2048, %s31_s19, [#allocation6], %s568_s30, %s568_s30, %s569_s6  }
  0x14   :  { %s494_s11 = scalar_lea.hbm %s675_s0, 256 }
  0x15   :  { %p495_p8 = scmp.ne.s32.totalorder %s675_s0, %s494_s11  ;;  %p498_p9 = scmp.lt.u32.totalorder %s494_s11, %s675_s0 }
  0x17   :  { %p500_p10 = pnand %p498_p9, %p495_p8 }
  0x19   :  { %503 = shalt.err (!%p500_p10)
}
  0x1a   :  { %s504_s16 = scalar_lea.vmem %s602_s21, 256  ;;  %p509_p12 = scmp.lt.s32.totalorder %s602_s21, %s602_s21 }
  0x1b   :  { %p505_p11 = scmp.ne.s32.totalorder %s602_s21, %s504_s16  ;;  %p510_p13 = scmp.lt.s32.totalorder %s504_s16, %s504_s16 }
  0x1d   :  { %p511_p0 = por %p510_p13, %p509_p12 }
  0x1f   :  { %p512_p1 = pnand %p511_p0, %p505_p11 }
  0x21   :  { %515 = shalt.err (!%p512_p1)
}
  0x22   :  { %24 = dma.hbm_to_vmem [thread:$0]  %s675_s0, 256, %s602_s21, [#allocation3], %s568_s30, %s568_s30, %s569_s6  }
  0x23   :  { %s570_s18 = smov [#allocation7]   ;;  %s516_s23 = scalar_lea.hbm %s678_s3, 2048 }
  0x24   :  { %s44_s19 = sshll.u32 %s570_s18, 4  ;;  %p517_p2 = scmp.ne.s32.totalorder %s678_s3, %s516_s23  ;;  %s45_s19 = int_to_ptr.vmem [resolvable:$true] %s44_s19 }
  0x25   :  { %p520_p3 = scmp.lt.u32.totalorder %s516_s23, %s678_s3 }
  0x27   :  { %p522_p4 = pnand %p520_p3, %p517_p2 }
  0x29   :  { %525 = shalt.err (!%p522_p4)
}
  0x2a   :  { %s526_s28 = scalar_lea.vmem %s45_s19, 2048  ;;  %p531_p6 = scmp.lt.s32.totalorder %s45_s19, %s45_s19 }
  0x2b   :  { %p527_p5 = scmp.ne.s32.totalorder %s45_s19, %s526_s28  ;;  %p532_p7 = scmp.lt.s32.totalorder %s526_s28, %s526_s28 }
  0x2d   :  { %p533_p8 = por %p532_p7, %p531_p6 }
  0x2f   :  { %p534_p9 = pnand %p533_p8, %p527_p5 }
  0x31   :  { %537 = shalt.err (!%p534_p9)
}
  0x32   :  { %50 = dma.hbm_to_vmem [thread:$0]  %s678_s3, 2048, %s45_s19, [#allocation6], %s568_s30, %s568_s30, %s569_s6  }
  0x33   :  { %560 = dma.done.wait [#allocation3], 256  }
  0x34   :  { %561 = vsyncadd [#allocation3], 4294967040 }
  0x35   :  { %562 = dma.done.wait [#allocation6], 4096  }
  0x36   :  { %563 = vsyncadd [#allocation6], 4294963200  ;;  %v64_v0 = vld [vmem:[#allocation5] sm:$0xff]  ;;  %v65_v1 = vld [vmem:[#allocation5 + $0x8] sm:$0xff]  ;;  %s571_s8 = smov [#allocation8]  }
  0x37   :  { %v66_v2 = vld [vmem:[#allocation5 + $0x10] sm:$0xff]  ;;  %v398_v3 = vpack.c.bf16 %v65_v1, %v64_v0  ;;  %v67_v4 = vld [vmem:[#allocation5 + $0x18] sm:$0xff]  ;;  %v68_v6 = vld [vmem:[#allocation5 + $0x20] sm:$0xff]  ;;  %s277_s9 = sshll.u32 %s571_s8, 4  ;;  %s278_s9 = int_to_ptr.vmem [resolvable:$true] %s277_s9 }
  0x38   :  { %v402_v5 = vpack.c.bf16 %v67_v4, %v66_v2  ;;  %v69_v7 = vld [vmem:[#allocation5 + $0x28] sm:$0xff]  ;;  %v70_v9 = vld [vmem:[#allocation5 + $0x30] sm:$0xff]  ;;  %v71_v10 = vld [vmem:[#allocation5 + $0x38] sm:$0xff]  ;;  %s538_s10 = scalar_lea.vmem %s278_s9, 256  ;;  %p543_p11 = scmp.lt.s32.totalorder %s278_s9, %s278_s9 }
  0x39   :  { %399 = vmatprep.subr.bf16.mxu0 %v398_v3  ;;  %v406_v8 = vpack.c.bf16 %v69_v7, %v68_v6  ;;  %v62_v11 = vld [vmem:[#allocation2] sm:$0xff]  ;;  %v172_v12 = vld [vmem:[#allocation7] sm:$0xff]  ;;  %v173_v13 = vld [vmem:[#allocation7 + $0x8] sm:$0xff]  ;;  %v410_v20 = vpack.c.bf16 %v71_v10, %v70_v9  ;;  %p539_p10 = scmp.ne.s32.totalorder %s278_s9, %s538_s10  ;;  %p544_p12 = scmp.lt.s32.totalorder %s538_s10, %s538_s10 }
  0x3a   :  { %401 = vmatpush3.bf16.msra.mxu0 %v398_v3  ;;  %360 = vmatprep.mubr.f32.mxu0 %v62_v11  ;;  %v174_v14 = vld [vmem:[#allocation7 + $0x10] sm:$0xff]  ;;  %v430_v15 = vpack.c.bf16 %v173_v13, %v172_v12  ;;  %v175_v16 = vld [vmem:[#allocation7 + $0x18] sm:$0xff]  ;;  %v176_v18 = vld [vmem:[#allocation7 + $0x20] sm:$0xff] }
  0x3b   :  { %403 = vmatprep.subr.bf16.mxu0 %v402_v5  ;;  %v434_v17 = vpack.c.bf16 %v175_v16, %v174_v14  ;;  %v177_v19 = vld [vmem:[#allocation7 + $0x28] sm:$0xff]  ;;  %v72_v21 = vld [vmem:[#allocation5 + $0x40] sm:$0xff]  ;;  %v74_v25 = vld [vmem:[#allocation5 + $0x50] sm:$0xff]  ;;  %p545_p13 = por %p544_p12, %p543_p11 }
  0x3c   :  { %431 = vmatprep.subr.bf16.mxu1 %v430_v15  ;;  %v73_v22 = vld [vmem:[#allocation5 + $0x48] sm:$0xff]  ;;  %v438_v23 = vpack.c.bf16 %v177_v19, %v176_v18  ;;  %v75_v26 = vld [vmem:[#allocation5 + $0x58] sm:$0xff]  ;;  %v76_v28 = vld [vmem:[#allocation5 + $0x60] sm:$0xff] }
  0x3d   :  { %433 = vmatpush3.bf16.msra.mxu1 %v430_v15  ;;  %v414_v24 = vpack.c.bf16 %v73_v22, %v72_v21  ;;  %v418_v27 = vpack.c.bf16 %v75_v26, %v74_v25  ;;  %v77_v29 = vld [vmem:[#allocation5 + $0x68] sm:$0xff]  ;;  %v78_v31 = vld [vmem:[#allocation5 + $0x70] sm:$0xff]  ;;  %v79_v32 = vld [vmem:[#allocation5 + $0x78] sm:$0xff]  ;;  %p546_p0 = pnand %p545_p13, %p539_p10 }
  0x3e   :  { %405 = vmatpush3.bf16.msra.mxu0 %v402_v5  ;;  %435 = vmatprep.subr.bf16.mxu1 %v434_v17  ;;  %v422_v30 = vpack.c.bf16 %v77_v29, %v76_v28  ;;  %v426_v33 = vpack.c.bf16 %v79_v32, %v78_v31  ;;  %v63_v34 = vld [vmem:[#allocation2 + $0x8] sm:$0xff]  ;;  %v178_v35 = vld [vmem:[#allocation7 + $0x30] sm:$0xff]  ;;  %v180_v38 = vld [vmem:[#allocation7 + $0x40] sm:$0xff] }
  0x3f   :  { %407 = vmatprep.subr.bf16.mxu0 %v406_v8  ;;  %v179_v36 = vld [vmem:[#allocation7 + $0x38] sm:$0xff]  ;;  %v181_v39 = vld [vmem:[#allocation7 + $0x48] sm:$0xff]  ;;  %v182_v41 = vld [vmem:[#allocation7 + $0x50] sm:$0xff] }
  0x40   :  { %v442_v37 = vpack.c.bf16 %v179_v36, %v178_v35  ;;  %v446_v40 = vpack.c.bf16 %v181_v39, %v180_v38  ;;  %v183_v42 = vld [vmem:[#allocation7 + $0x58] sm:$0xff]  ;;  %v184_v44 = vld [vmem:[#allocation7 + $0x60] sm:$0xff]  ;;  %v185_v45 = vld [vmem:[#allocation7 + $0x68] sm:$0xff] }
  0x41   :  { %437 = vmatpush3.bf16.msra.mxu1 %v434_v17  ;;  %v450_v43 = vpack.c.bf16 %v183_v42, %v182_v41  ;;  %v454_v46 = vpack.c.bf16 %v185_v45, %v184_v44  ;;  %v186_v47 = vld [vmem:[#allocation7 + $0x70] sm:$0xff]  ;;  %v187_v48 = vld [vmem:[#allocation7 + $0x78] sm:$0xff] }
  0x42   :  { %409 = vmatpush3.bf16.msra.mxu0 %v406_v8  ;;  %439 = vmatprep.subr.bf16.mxu1 %v438_v23  ;;  %v458_v49 = vpack.c.bf16 %v187_v48, %v186_v47  ;;  %v290_v50 = vld [vmem:[%s677_s2] ss:$0 sm:$0xff] }
  0x43   :  { %411 = vmatprep.subr.bf16.mxu0 %v410_v20  ;;  %v291_v1 = vld [vmem:[%s679_s4] ss:$0 sm:$0xff] }
  0x45   :  { %441 = vmatpush3.bf16.msra.mxu1 %v438_v23 }
  0x46   :  { %413 = vmatpush3.bf16.msra.mxu0 %v410_v20  ;;  %443 = vmatprep.subr.bf16.mxu1 %v442_v37 }
  0x47   :  { %415 = vmatprep.subr.bf16.mxu0 %v414_v24 }
  0x49   :  { %445 = vmatpush3.bf16.msra.mxu1 %v442_v37 }
  0x4a   :  { %417 = vmatpush3.bf16.msra.mxu0 %v414_v24  ;;  %447 = vmatprep.subr.bf16.mxu1 %v446_v40 }
  0x4b   :  { %419 = vmatprep.subr.bf16.mxu0 %v418_v27 }
  0x4d   :  { %449 = vmatpush3.bf16.msra.mxu1 %v446_v40 }
  0x4e   :  { %421 = vmatpush3.bf16.msra.mxu0 %v418_v27  ;;  %451 = vmatprep.subr.bf16.mxu1 %v450_v43 }
  0x4f   :  { %423 = vmatprep.subr.bf16.mxu0 %v422_v30 }
  0x51   :  { %453 = vmatpush3.bf16.msra.mxu1 %v450_v43 }
  0x52   :  { %425 = vmatpush3.bf16.msra.mxu0 %v422_v30  ;;  %455 = vmatprep.subr.bf16.mxu1 %v454_v46 }
  0x53   :  { %427 = vmatprep.subr.bf16.mxu0 %v426_v33 }
  0x55   :  { %457 = vmatpush3.bf16.msra.mxu1 %v454_v46 }
  0x56   :  { %429 = vmatpush3.bf16.msra.mxu0 %v426_v33  ;;  %459 = vmatprep.subr.bf16.mxu1 %v458_v49 }
  0x59   :  { %361 = vmatmul.mubr.f32.vlgmr.msra.gmra.mrb[0].mxu0 %v63_v34  ;;  %461 = vmatpush3.bf16.msra.mxu1 %v458_v49 }
 0x12c   :  { %v362_v51 = vpop.f32.mrb[0].mxu0 }
 0x12d   :  { %v159_v52 = vadd.f32 %v362_v51, %v290_v50  ;;  %v153_v53 = vpop.f32.mrb[1].mxu0 }
 0x12e   :  { %v154_v54 = vadd.f32 %v290_v50, %v153_v53 }
 0x12f   :  { %v165_v55 = vmul.f32 0.70710677, %v159_v52  ;;  %v163_v62 = vmul.f32 0.5, %v159_v52 }
 0x130   :  { %v164_v56 = vmul.f32 0.70710677, %v154_v54  ;;  %v162_v60 = vmul.f32 0.5, %v154_v54 }
 0x131   :  { %468 = verf.f32 %v165_v55 }
 0x132   :  { %470 = verf.f32 %v164_v56 }
 0x13b   :  { %v469_v57 = vpop.eup %468 }
 0x13c   :  { %v471_v58 = vpop.eup %470  ;;  %v169_v59 = vadd.f32 1.0, %v469_v57 }
 0x13d   :  { %v168_v61 = vadd.f32 1.0, %v471_v58 }
 0x13e   :  { %v171_v0 = vmul.f32 %v169_v59, %v163_v62 }
 0x13f   :  { %v170_v63 = vmul.f32 %v168_v61, %v162_v60 }
 0x141   :  { %395 = vmatprep.mubr.f32.mxu1 %v170_v63 }
 0x142   :  { %396 = vmatmul.mubr.f32.vlgmr.msra.gmra.mrb[0].mxu1 %v171_v0 }
 0x215   :  { %v397_v2 = vpop.f32.mrb[0].mxu1 }
 0x216   :  { %v267_v3 = vadd.f32 %v397_v2, %v291_v1  ;;  %v261_v4 = vpop.f32.mrb[1].mxu1 }
 0x217   :  { %v262_v5 = vadd.f32 %v291_v1, %v261_v4 }
 0x218   :  { %271 = vst [vmem:[#allocation8 + $0x8] sm:$0xff] %v267_v3 }
 0x219   :  { %270 = vst [vmem:[#allocation8] sm:$0xff] %v262_v5 }
 0x21a   :  { %549 = shalt.err (!%p546_p0)
}
 0x21b   :  { %s550_s4 = scalar_lea.hbm %s680_s5, 256 }
 0x21c   :  { %p551_p1 = scmp.ne.s32.totalorder %s680_s5, %s550_s4  ;;  %p554_p2 = scmp.lt.u32.totalorder %s550_s4, %s680_s5 }
 0x21e   :  { %p556_p3 = pnand %p554_p2, %p551_p1 }
 0x220   :  { %559 = shalt.err (!%p556_p3)
}
 0x221   :  { %283 = dma.vmem_to_hbm [thread:$0]  %s278_s9, 256, %s680_s5, [#allocation4], %s568_s30, %s568_s30, %s569_s6  }
 0x222   :  { %564 = dma.done.wait [#allocation4], 256  }
 0x223   :  { %565 = vsyncadd [#allocation4], 4294967040 }
 0x224   :  { %287 = vsyncpa [#allocation3], 1 }
 0x225   :  { %288 = vsyncpa [#allocation6], 1 }
 0x226   :  { %289 = vsyncpa [#allocation4], 1 }

</bundles_post_ra>
